<compile_context>
chip_gen: v5e
topology: v5e:2x2
jax: 0.10.0
libtpu: 0.0.40
codegen_flags: <defaults>
</compile_context>

<pallas_src>
import functools

import jax
import jax.numpy as jnp
from jax.experimental import pallas as pl
from jax.experimental.pallas import tpu as pltpu

_LANES = 128
_MEGACORE_SPLIT_BYTES = 2 * 1024 * 1024  # split single-step grids bigger than this
_ONE_SIXTH = 1.0 / 6.0


def _h_sigmoid_kernel(x_ref, o_ref):
    x = x_ref[...]
    # ReLU6(x + 3) / 6 == clamp(x + 3, 0, 6) * (1/6); constant multiply keeps
    # the whole body on the VPU (no EUP reciprocal).
    one_sixth = jnp.asarray(_ONE_SIXTH, dtype=x.dtype)
    o_ref[...] = (jnp.clip(x + 3.0, 0.0, 6.0) * one_sixth).astype(o_ref.dtype)


def _h_sigmoid_jnp(x):
    return jnp.clip(x + 3.0, 0.0, 6.0) * jnp.asarray(_ONE_SIXTH, dtype=x.dtype)


def _sublane_multiple(dtype) -> int:
    itemsize = jnp.dtype(dtype).itemsize
    return {4: 8, 2: 16, 1: 32}.get(itemsize, 8)


@functools.lru_cache(maxsize=None)
def _target_tile_bytes() -> int:
    """Generation-aware input-tile size in bytes."""
    try:
        vmem_bytes = int(pltpu.get_tpu_info().vmem_capacity_bytes)
        if vmem_bytes <= (64 << 20):
            # v7x: only 64 MiB VMEM/TC but ~3.2 TB/s HBM -> bigger blocks cut
            # the per-grid-step tax. 4 bufs x 6 MiB = 24 MiB, well within budget.
            return 6 * 1024 * 1024
    except Exception:
        pass
    # v5e / v6e (128 MiB VMEM): 4 MiB tiles; the explicit vmem_limit_bytes
    # below keeps us clear of the v5e 16 MiB scoped default.
    return 4 * 1024 * 1024


def _choose_cols(n: int) -> int:
    """Widest lane-dense slab width (multiple of 128) dividing n, else 0."""
    for c in (4096, 2048, 1024, 512, 256, 128):
        if n % c == 0:
            return c
    return 0


def _run_2d(x2d: jax.Array, tile_rows: int) -> jax.Array:
    rows, cols = x2d.shape
    itemsize = jnp.dtype(x2d.dtype).itemsize
    tile_bytes = tile_rows * cols * itemsize
    # in + out, double-buffered, plus headroom for compiler scratch; never
    # below the smallest generation default, never above v7x physical VMEM.
    vmem_limit = min(max(4 * tile_bytes + (4 << 20), 16 << 20), 48 << 20)
    grid = (pl.cdiv(rows, tile_rows),)
    return pl.pallas_call(
        _h_sigmoid_kernel,
        out_shape=jax.ShapeDtypeStruct((rows, cols), x2d.dtype),
        grid_spec=pl.GridSpec(
            grid=grid,
            in_specs=[pl.BlockSpec((tile_rows, cols), lambda i: (i, 0))],
            out_specs=pl.BlockSpec((tile_rows, cols), lambda i: (i, 0)),
        ),
        compiler_params=pltpu.CompilerParams(
            dimension_semantics=("parallel",),
            vmem_limit_bytes=vmem_limit,
        ),
        cost_estimate=pl.CostEstimate(
            flops=4 * rows * cols,
            transcendentals=0,
            bytes_accessed=2 * rows * cols * itemsize,
        ),
    )(x2d)


def _run_flat_aligned(x_flat: jax.Array) -> jax.Array:
    """Run the kernel on a flat array whose size is a multiple of 128."""
    n = x_flat.shape[0]
    dtype = x_flat.dtype
    itemsize = jnp.dtype(dtype).itemsize
    sub = _sublane_multiple(dtype)

    cols = _choose_cols(n)
    rows = n // cols
    slab_bytes = n * itemsize

    target = _target_tile_bytes()
    tile_rows = max(1, target // (cols * itemsize))
    if tile_rows >= rows:
        if slab_bytes > _MEGACORE_SPLIT_BYTES and rows > sub:
            # Medium slab that would otherwise be a 1-step grid: split into
            # >=2 sublane-aligned row tiles so both v7x TensorCores get work.
            half = pl.cdiv(rows, 2)
            tile_rows = min(rows, ((half + sub - 1) // sub) * sub)
        else:
            tile_rows = rows
    else:
        tile_rows = max(sub, (tile_rows // sub) * sub)

    return _run_2d(x_flat.reshape(rows, cols), tile_rows)


def h_sigmoid(x: jax.Array) -> jax.Array:
    """Elementwise hard-sigmoid matching torch: relu6(x + 3) / 6."""
    orig_shape = x.shape
    n = x.size
    if n == 0:
        return x

    x_flat = jnp.ravel(x)

    if n % _LANES == 0:
        out_flat = _run_flat_aligned(x_flat).reshape(-1)
    else:
        bulk = (n // _LANES) * _LANES
        if bulk == 0:
            # Tiny (<128 elements): a kernel launch is pure overhead.
            out_flat = _h_sigmoid_jnp(x_flat)
        else:
            # Kernel on the 128-aligned prefix, plain jnp on the short tail:
            # avoids the pad-concat + slice double pass over the whole array.
            bulk_out = _run_flat_aligned(x_flat[:bulk]).reshape(-1)
            tail_out = _h_sigmoid_jnp(x_flat[bulk:])
            out_flat = jnp.concatenate([bulk_out, tail_out])

    return out_flat.reshape(orig_shape)


if __name__ == "__main__":
    def ref_fn(v):
        return jnp.clip(v + 3.0, 0.0, 6.0) / 6.0

    # 1) NCHW main case (matches the PyTorch module usage).
    x = jax.random.normal(jax.random.PRNGKey(0), (2, 4, 16, 16), dtype=jnp.float32) * 4.0
    out = jax.block_until_ready(h_sigmoid(x))
    assert out.shape == x.shape and out.dtype == x.dtype
    assert jnp.max(jnp.abs(out - ref_fn(x))) < 1e-6

    # 2) Tiny, non-128-aligned input (<128 elements): pure jnp tail path.
    x2 = jax.random.normal(jax.random.PRNGKey(1), (3, 5, 7), dtype=jnp.float32) * 4.0
    out2 = jax.block_until_ready(h_sigmoid(x2))
    assert out2.shape == x2.shape
    assert jnp.max(jnp.abs(out2 - ref_fn(x2))) < 1e-6

    # 3) Non-aligned input with a 128-aligned bulk prefix + jnp tail.
    x3 = jax.random.normal(jax.random.PRNGKey(2), (5, 7, 11), dtype=jnp.float32) * 4.0
    out3 = jax.block_until_ready(h_sigmoid(x3))
    assert out3.shape == x3.shape
    assert jnp.max(jnp.abs(out3 - ref_fn(x3))) < 1e-6

    # 4) Larger slab: exercises the multi-step grid / megacore row split.
    x4 = jax.random.normal(jax.random.PRNGKey(3), (4, 16, 128, 128), dtype=jnp.float32) * 4.0
    out4 = jax.block_until_ready(h_sigmoid(x4))
    assert out4.shape == x4.shape
    assert jnp.max(jnp.abs(out4 - ref_fn(x4))) < 1e-6

    # 5) bf16 path (different sublane multiple).
    x5 = jax.random.normal(jax.random.PRNGKey(4), (2, 4, 16, 16), dtype=jnp.bfloat16) * 4.0
    out5 = jax.block_until_ready(h_sigmoid(x5))
    assert out5.shape == x5.shape and out5.dtype == jnp.bfloat16
    assert jnp.max(jnp.abs(out5.astype(jnp.float32)
                           - ref_fn(x5.astype(jnp.float32)))) < 5e-2

    print("KERNEL_OK")
</pallas_src>

<mosaic_0001>
module attributes {stable_mosaic.version = 11 : i64} {
  func.func @_h_sigmoid_kernel(%arg0: i32, %arg1: memref<1x2048xf32, #tpu.memory_space<vmem>>, %arg2: memref<1x2048xf32, #tpu.memory_space<vmem>>) attributes {dimension_semantics = [#tpu.dimension_semantics<parallel>], iteration_bounds = array<i64: 1>, scalar_prefetch = 0 : i64, scratch_operands = 0 : i64, tpu.core_type = #tpu.core_type<tc>, window_params = [{transform_indices = @transform_0, window_bounds = array<i64: 1, 2048>}, {transform_indices = @transform_1, window_bounds = array<i64: 1, 2048>}]} {
    %c0 = arith.constant 0 : index
    %c0_0 = arith.constant 0 : index
    %0 = vector.load %arg1[%c0, %c0_0] : memref<1x2048xf32, #tpu.memory_space<vmem>>, vector<1x2048xf32>
    %cst = arith.constant 3.000000e+00 : f32
    %1 = vector.broadcast %cst : f32 to vector<1x2048xf32>
    %2 = arith.addf %0, %1 : vector<1x2048xf32>
    %cst_1 = arith.constant 0.000000e+00 : f32
    %cst_2 = arith.constant 6.000000e+00 : f32
    %3 = vector.broadcast %cst_1 : f32 to vector<1x2048xf32>
    %4 = arith.maximumf %3, %2 : vector<1x2048xf32>
    %5 = vector.broadcast %cst_2 : f32 to vector<1x2048xf32>
    %6 = arith.minimumf %5, %4 : vector<1x2048xf32>
    %cst_3 = arith.constant 0.166666672 : f32
    %7 = vector.broadcast %cst_3 : f32 to vector<1x2048xf32>
    %8 = arith.mulf %6, %7 : vector<1x2048xf32>
    %c0_4 = arith.constant 0 : index
    %c0_5 = arith.constant 0 : index
    %9 = vector.load %arg2[%c0_4, %c0_5] : memref<1x2048xf32, #tpu.memory_space<vmem>>, vector<1x2048xf32>
    tpu.vector_store %arg2[%c0_4, %c0_5], %8 {strides = array<i32>} : memref<1x2048xf32, #tpu.memory_space<vmem>>, vector<1x2048xf32>,
    return
  }
  func.func @transform_0(%arg0: i32) -> (i32, i32) {
    %c0_i32 = arith.constant 0 : i32
    %c0_i32_0 = arith.constant 0 : i32
    return %arg0, %c0_i32 : i32, i32
  }
  func.func @transform_1(%arg0: i32) -> (i32, i32) {
    %c0_i32 = arith.constant 0 : i32
    %c0_i32_0 = arith.constant 0 : i32
    return %arg0, %c0_i32 : i32, i32
  }
}

</mosaic_0001>

<bundles_post_ra>
// kernel: tpu_custom_call.1
= control target key start
LH: loop header
LB: loop body
LE: loop exit
PB: predicated region body
PF: predicated region fallthrough
CT: control target
= control target key end

     0   :  { %6 = vsyncpa [#allocation3], 0  ;;  %s124_s0 = inlined_call_operand.hbm [shape: f32[1,2048], index: 0, kind: input, shape index: {}]   ;;  %s125_s1 = inlined_call_operand.hbm [shape: f32[1,2048], index: 1, kind: output, shape index: {}]  }
   0x1   :  { %7 = vsyncpa [#allocation4], 0  ;;  %s13_s8 = sshll.u32 %s124_s0, 4  ;;  %s106_s9 = smov [#allocation2]   ;;  %s14_s8 = int_to_ptr.hbm [resolvable:$true] %s13_s8 }
   0x2   :  { %s15_s10 = sshll.u32 %s106_s9, 4  ;;  %s16_s10 = int_to_ptr.vmem [resolvable:$true] %s15_s10 }
   0x3   :  { %18 = dma.hbm_to_vmem [thread:$0]  %s14_s8, 256, %s16_s10, [#allocation3]  }
   0x4   :  { %102 = dma.done.wait [#allocation3], 256  }
   0x5   :  { %103 = vsyncadd [#allocation3], 4294967040  ;;  %v23_v0 = vld [vmem:[#allocation2] sm:$0xff]  ;;  %v24_v1 = vld [vmem:[#allocation2 + $0x8] sm:$0xff]  ;;  %s107_s11 = smov [#allocation5]   ;;  %s42_s0 = sshll.u32 %s125_s1, 4  ;;  %s43_s0 = int_to_ptr.hbm [resolvable:$true] %s42_s0 }
   0x6   :  { %v25_v2 = vadd.f32 3.0, %v23_v0  ;;  %v26_v3 = vadd.f32 3.0, %v24_v1  ;;  %s40_s12 = sshll.u32 %s107_s11, 4  ;;  %s41_s12 = int_to_ptr.vmem [resolvable:$true] %s40_s12 }
   0x8   :  { %v27_v4 = vmax.f32 %v25_v2, 0.0  ;;  %v28_v5 = vmax.f32 %v26_v3, 0.0 }
   0xa   :  { %v29_v6 = vmin.f32 %v27_v4, 6.0  ;;  %v30_v7 = vmin.f32 %v28_v5, 6.0 }
   0xc   :  { %v31_v8 = vmul.f32 0.16666667, %v29_v6  ;;  %v32_v9 = vmul.f32 0.16666667, %v30_v7 }
   0xe   :  { %33 = vst [vmem:[#allocation5] sm:$0xff] %v31_v8 }
   0xf   :  { %34 = vst [vmem:[#allocation5 + $0x8] sm:$0xff] %v32_v9 }
  0x10   :  { %45 = dma.vmem_to_hbm [thread:$0]  %s41_s12, 256, %s43_s0, [#allocation4]  }
  0x11   :  { %104 = dma.done.wait [#allocation4], 256  }
  0x12   :  { %105 = vsyncadd [#allocation4], 4294967040 }
  0x13   :  { %50 = vsyncpa [#allocation3], 1 }
  0x14   :  { %51 = vsyncpa [#allocation4], 1 }

</bundles_post_ra>
